<compile_context>
chip_gen: v6e
topology: v6e:2x2x1
jax: 0.10.0
libtpu: 0.0.40
codegen_flags: <defaults>
</compile_context>

<pallas_src>
import numpy as np
import jax
import jax.numpy as jnp
from jax.experimental import pallas as pl
from jax.experimental.pallas import tpu as pltpu


def _round_up(x, m):
    return (x + m - 1) // m * m


def _clock_kernel(x_ref, w_ref, v_ref, out_ref):
    # x: (TB, S*N), w: (S*N, TP), v: (TP, 1) -- all f32 tiles in VMEM.
    x = x_ref[...].astype(jnp.float32)
    m = jnp.dot(x, w_ref[...], preferred_element_type=jnp.float32)      # (TB, TP)  MXU
    term = 2.0 * m * m - 1.0                                            # (TB, TP)  VPU
    # Per-row reduction routed through the MXU as (TB, TP) @ (TP, 1).
    # Padded columns give term = -1 but v is zero there, so they contribute 0.
    out_ref[...] = -jnp.dot(term, v_ref[...], preferred_element_type=jnp.float32)  # (TB, 1)


def clock_model_one_hot(x, coefficients):
    """x: (..., S, N) array; coefficients: dict[tuple[int, ...], real]. Returns (..., 1)."""
    *lead, S, N = x.shape
    B = int(np.prod(lead)) if lead else 1
    SN = S * N
    keys = list(coefficients.keys())
    T = len(keys)
    TP = _round_up(max(T, 1), 128)            # lane-dense padded term dimension

    # Fused weight matrix and zero-padded coefficient column (built once on host).
    cos_j = np.cos(2.0 * np.pi * np.arange(N, dtype=np.float64) / N).astype(np.float32)
    w_np = np.zeros((SN, TP), dtype=np.float32)
    v_np = np.zeros((TP, 1), dtype=np.float32)
    for t, key in enumerate(keys):
        idxs = [int(i) for i in key]
        inv = np.float32(1.0 / len(idxs))
        for i in idxs:
            w_np[i * N:(i + 1) * N, t] = cos_j * inv
        v_np[t, 0] = np.float32(coefficients[key])
    w = jnp.asarray(w_np)
    v = jnp.asarray(v_np)

    # Batch tiling: largest multiple-of-8 tile with the double-buffered x slab
    # well under the smallest per-generation VMEM (v7x: 64 MiB physical).
    # TODO(synk): for strictly one-hot inputs, bf16 x would halve HBM traffic.
    x_bytes = 4
    per_buf_budget = 8 << 20                                   # per x buffer
    max_rows = max(8, (per_buf_budget // (2 * SN * x_bytes)) // 8 * 8)
    TB = int(max(8, min(512, max_rows, _round_up(B, 8))))
    B_pad = _round_up(B, TB)

    x2d = jnp.reshape(x.astype(jnp.float32), (B, SN))
    if B_pad != B:
        x2d = jnp.pad(x2d, ((0, B_pad - B), (0, 0)))           # padded rows sliced off below

    vmem_bytes = 4 * (2 * TB * SN + SN * TP + TP + 2 * TB * TP + 2 * TB) + (2 << 20)
    vmem_bytes = int(min(max(vmem_bytes, 16 << 20), 48 << 20))

    out = pl.pallas_call(
        _clock_kernel,
        out_shape=jax.ShapeDtypeStruct((B_pad, 1), jnp.float32),
        grid=(B_pad // TB,),
        in_specs=[
            pl.BlockSpec((TB, SN), lambda i: (i, 0)),           # pipelined batch tiles
            pl.BlockSpec((SN, TP), lambda i: (0, 0)),           # W resident across grid steps
            pl.BlockSpec((TP, 1), lambda i: (0, 0)),            # v resident across grid steps
        ],
        out_specs=pl.BlockSpec((TB, 1), lambda i: (i, 0)),
        compiler_params=pltpu.CompilerParams(
            dimension_semantics=("parallel",),                  # shards across v7x's 2 TCs
            vmem_limit_bytes=vmem_bytes,
        ),
    )(x2d, w, v)

    out = out[:B]
    return jnp.reshape(out, (*lead, 1)) if lead else jnp.reshape(out, (1,))


def _reference_forward(x, coefficients):
    """Direct JAX transcription of the PyTorch forward (for validation)."""
    idx = x.ndim - 2
    N = x.shape[-1]
    s_j_vec = jnp.cos(2.0 * jnp.pi * jnp.arange(N, dtype=jnp.float32) / N).reshape(N, 1)
    total = 0.0
    for key, val in coefficients.items():
        sel = x[..., jnp.asarray(list(key)), :]                 # (..., |key|, N)
        mm = jnp.matmul(sel, s_j_vec)                           # (..., |key|, 1)
        total = total - val * (2.0 * jnp.mean(mm, axis=idx) ** 2 - 1.0)
    return total                                                # (..., 1)


if __name__ == "__main__":
    B, S, N = 2, 8, 16  # batch, sites, clock states

    coefficients = {
        (0,): 1.0,
        (1,): -0.5,
        (0, 1): 0.75,
        (2, 3): 1.25,
        (4, 5, 6): -0.3,
        (1, 7): 2.0,
    }

    # Deterministic one-hot input: each site picks one of N clock states.
    key = jax.random.PRNGKey(0)
    states = jax.random.randint(key, (B, S), minval=0, maxval=N)
    x = jax.nn.one_hot(states, N, dtype=jnp.float32)            # (B, S, N)

    out = clock_model_one_hot(x, coefficients)
    out = jax.block_until_ready(out)

    ref = _reference_forward(x, coefficients)
    assert out.shape == (B, 1), out.shape
    np.testing.assert_allclose(np.asarray(out), np.asarray(ref), rtol=1e-5, atol=1e-5)

    print("KERNEL_OK")
</pallas_src>

<mosaic_0001>
module attributes {stable_mosaic.version = 11 : i64} {
  func.func @_clock_kernel(%arg0: i32, %arg1: memref<8x128xf32, #tpu.memory_space<vmem>>, %arg2: memref<128x128xf32, #tpu.memory_space<vmem>>, %arg3: memref<128x1xf32, #tpu.memory_space<vmem>>, %arg4: memref<8x1xf32, #tpu.memory_space<vmem>>) attributes {dimension_semantics = [#tpu.dimension_semantics<parallel>], iteration_bounds = array<i64: 1>, scalar_prefetch = 0 : i64, scratch_operands = 0 : i64, tpu.core_type = #tpu.core_type<tc>, window_params = [{transform_indices = @transform_0, window_bounds = array<i64: 8, 128>}, {pipeline_mode = #tpu.pipeline_mode<synchronous>, transform_indices = @transform_1, window_bounds = array<i64: 128, 128>}, {pipeline_mode = #tpu.pipeline_mode<synchronous>, transform_indices = @transform_2, window_bounds = array<i64: 128, 1>}, {transform_indices = @transform_3, window_bounds = array<i64: 8, 1>}]} {
    %c0 = arith.constant 0 : index
    %c0_0 = arith.constant 0 : index
    %0 = vector.load %arg1[%c0, %c0_0] : memref<8x128xf32, #tpu.memory_space<vmem>>, vector<8x128xf32>
    %c0_1 = arith.constant 0 : index
    %c0_2 = arith.constant 0 : index
    %1 = vector.load %arg2[%c0_1, %c0_2] : memref<128x128xf32, #tpu.memory_space<vmem>>, vector<128x128xf32>
    %cst = arith.constant dense<0.000000e+00> : vector<8x128xf32>
    %2 = tpu.matmul %0, %1, %cst {dimension_numbers = #tpu.dot_dimension_numbers<[1], [0], [0], [1], [0, 0, 1, 1], [], []>} : vector<8x128xf32>, vector<128x128xf32>, vector<8x128xf32> -> vector<8x128xf32>
    %cst_3 = arith.constant 2.000000e+00 : f32
    %3 = vector.broadcast %cst_3 : f32 to vector<8x128xf32>
    %4 = arith.mulf %3, %2 : vector<8x128xf32>
    %5 = arith.mulf %4, %2 : vector<8x128xf32>
    %cst_4 = arith.constant 1.000000e+00 : f32
    %6 = vector.broadcast %cst_4 : f32 to vector<8x128xf32>
    %7 = arith.subf %5, %6 : vector<8x128xf32>
    %c0_5 = arith.constant 0 : index
    %c0_6 = arith.constant 0 : index
    %8 = vector.load %arg3[%c0_5, %c0_6] : memref<128x1xf32, #tpu.memory_space<vmem>>, vector<128x1xf32>
    %cst_7 = arith.constant dense<0.000000e+00> : vector<8x1xf32>
    %9 = tpu.matmul %7, %8, %cst_7 {dimension_numbers = #tpu.dot_dimension_numbers<[1], [0], [0], [1], [0, 0, 1, 1], [], []>} : vector<8x128xf32>, vector<128x1xf32>, vector<8x1xf32> -> vector<8x1xf32>
    %cst_8 = arith.constant 0.000000e+00 : f32
    %10 = vector.broadcast %cst_8 : f32 to vector<8x1xf32>
    %11 = arith.subf %10, %9 : vector<8x1xf32>
    %c0_9 = arith.constant 0 : index
    %c0_10 = arith.constant 0 : index
    %12 = vector.load %arg4[%c0_9, %c0_10] : memref<8x1xf32, #tpu.memory_space<vmem>>, vector<8x1xf32>
    tpu.vector_store %arg4[%c0_9, %c0_10], %11 {strides = array<i32>} : memref<8x1xf32, #tpu.memory_space<vmem>>, vector<8x1xf32>,
    return
  }
  func.func @transform_0(%arg0: i32) -> (i32, i32) {
    %c0_i32 = arith.constant 0 : i32
    %c0_i32_0 = arith.constant 0 : i32
    return %arg0, %c0_i32 : i32, i32
  }
  func.func @transform_1(%arg0: i32) -> (i32, i32) {
    %c0_i32 = arith.constant 0 : i32
    %c0_i32_0 = arith.constant 0 : i32
    %c0_i32_1 = arith.constant 0 : i32
    return %c0_i32, %c0_i32_0 : i32, i32
  }
  func.func @transform_2(%arg0: i32) -> (i32, i32) {
    %c0_i32 = arith.constant 0 : i32
    %c0_i32_0 = arith.constant 0 : i32
    %c0_i32_1 = arith.constant 0 : i32
    return %c0_i32, %c0_i32_0 : i32, i32
  }
  func.func @transform_3(%arg0: i32) -> (i32, i32) {
    %c0_i32 = arith.constant 0 : i32
    %c0_i32_0 = arith.constant 0 : i32
    return %arg0, %c0_i32 : i32, i32
  }
}

</mosaic_0001>

<bundles_post_ra>
// kernel: tpu_custom_call.1
= control target key start
LH: loop header
LB: loop body
LE: loop exit
PB: predicated region body
PF: predicated region fallthrough
CT: control target
= control target key end

     0   :  { %8 = vsyncpa [#allocation3], 0  ;;  %s340_s12 = smov [#allocation2]   ;;  %s499_s0 = inlined_call_operand.hbm [shape: f32[8,128], index: 0, kind: input, shape index: {}]   ;;  %s500_s1 = inlined_call_operand.vmem [shape: f32[128,128], index: 1, kind: input, shape index: {}]   ;;  %s501_s2 = inlined_call_operand.vmem [shape: f32[128,1], index: 2, kind: input, shape index: {}]   ;;  %s502_s3 = inlined_call_operand.vmem [shape: f32[8,1], index: 3, kind: output, shape index: {}]  }
   0x1   :  { %s15_s13 = sshll.u32 %s340_s12, 4  ;;  %s16_s13 = int_to_ptr.vmem [resolvable:$true] %s15_s13 }
   0x2   :  { %s326_s14 = scalar_lea.vmem %s16_s13, 128  ;;  %p331_p1 = scmp.lt.s32.totalorder %s16_s13, %s16_s13 }
   0x3   :  { %p327_p0 = scmp.ne.s32.totalorder %s16_s13, %s326_s14  ;;  %p332_p2 = scmp.lt.s32.totalorder %s326_s14, %s326_s14 }
   0x5   :  { %p333_p3 = por %p332_p2, %p331_p1 }
   0x7   :  { %p334_p4 = pnand %p333_p3, %p327_p0 }
   0x9   :  { %337 = shalt.err (!%p334_p4)
}
   0xa   :  { %18 = dma.hbm_to_vmem [thread:$0]  %s499_s0, 128, %s16_s13, [#allocation3]  }
   0xb   :  { %338 = dma.done.wait [#allocation3], 128  }
   0xc   :  { %339 = vsyncadd [#allocation3], 4294967168  ;;  %v341_v0 = vmov 0.0   ;;  %vm342_vm0 = vmmov 0   ;;  %v42_v1 = vld [vmem:[%s500_s1 + $0x78] sm:$0xff]  ;;  %v41_v2 = vld [vmem:[%s500_s1 + $0x70] sm:$0xff] }
   0xd   :  { %245 = vmatprep.subr.mxu0 %v341_v0  ;;  %277 = vmatprep.mubr.msk.f32.mxu0 %vm342_vm0, %v341_v0  ;;  %v40_v3 = vld [vmem:[%s500_s1 + $0x68] sm:$0xff]  ;;  %v39_v4 = vld [vmem:[%s500_s1 + $0x60] sm:$0xff]  ;;  %v131_v5 = vld [vmem:[%s501_s2 + $0x78] sm:$0xff]  ;;  %vm203_vm1 = vcmask 7168  }
   0xe   :  { %280 = vmatprep.subr.mxu1 %v341_v0  ;;  %312 = vmatprep.mubr.msk.f32.mxu1 %vm342_vm0, %v341_v0  ;;  %v38_v6 = vld [vmem:[%s500_s1 + $0x58] sm:$0xff]  ;;  %v130_v7 = vld [vmem:[%s501_s2 + $0x70] sm:$0xff]  ;;  %v129_v8 = vld [vmem:[%s501_s2 + $0x68] sm:$0xff] }
   0xf   :  { %246 = vmatpush3.msra.mxu0 %v42_v1  ;;  %281 = vmatpush3.msra.mxu1 %v131_v5  ;;  %v37_v9 = vld [vmem:[%s500_s1 + $0x50] sm:$0xff]  ;;  %v128_v10 = vld [vmem:[%s501_s2 + $0x60] sm:$0xff]  ;;  %v36_v11 = vld [vmem:[%s500_s1 + $0x48] sm:$0xff] }
  0x10   :  { %247 = vmatprep.subr.mxu0 %v341_v0  ;;  %282 = vmatprep.subr.mxu1 %v341_v0  ;;  %v127_v12 = vld [vmem:[%s501_s2 + $0x58] sm:$0xff]  ;;  %v35_v13 = vld [vmem:[%s500_s1 + $0x40] sm:$0xff]  ;;  %v126_v14 = vld [vmem:[%s501_s2 + $0x50] sm:$0xff] }
  0x11   :  { %248 = vmatpush3.msra.mxu0 %v41_v2  ;;  %283 = vmatpush3.msra.mxu1 %v130_v7  ;;  %v34_v15 = vld [vmem:[%s500_s1 + $0x38] sm:$0xff]  ;;  %v125_v16 = vld [vmem:[%s501_s2 + $0x48] sm:$0xff]  ;;  %v33_v17 = vld [vmem:[%s500_s1 + $0x30] sm:$0xff] }
  0x12   :  { %249 = vmatprep.subr.mxu0 %v341_v0  ;;  %284 = vmatprep.subr.mxu1 %v341_v0  ;;  %v124_v18 = vld [vmem:[%s501_s2 + $0x40] sm:$0xff]  ;;  %v32_v19 = vld [vmem:[%s500_s1 + $0x28] sm:$0xff]  ;;  %v123_v20 = vld [vmem:[%s501_s2 + $0x38] sm:$0xff] }
  0x13   :  { %250 = vmatpush3.msra.mxu0 %v40_v3  ;;  %285 = vmatpush3.msra.mxu1 %v129_v8  ;;  %v31_v21 = vld [vmem:[%s500_s1 + $0x20] sm:$0xff]  ;;  %v122_v22 = vld [vmem:[%s501_s2 + $0x30] sm:$0xff]  ;;  %v30_v23 = vld [vmem:[%s500_s1 + $0x18] sm:$0xff] }
  0x14   :  { %251 = vmatprep.subr.mxu0 %v341_v0  ;;  %286 = vmatprep.subr.mxu1 %v341_v0  ;;  %v121_v24 = vld [vmem:[%s501_s2 + $0x28] sm:$0xff]  ;;  %v29_v25 = vld [vmem:[%s500_s1 + $0x10] sm:$0xff]  ;;  %v120_v26 = vld [vmem:[%s501_s2 + $0x20] sm:$0xff] }
  0x15   :  { %252 = vmatpush3.msra.mxu0 %v39_v4  ;;  %287 = vmatpush3.msra.mxu1 %v128_v10  ;;  %v28_v27 = vld [vmem:[%s500_s1 + $0x8] sm:$0xff]  ;;  %v27_v28 = vld [vmem:[%s500_s1] sm:$0xff]  ;;  %v119_v30 = vld [vmem:[%s501_s2 + $0x18] sm:$0xff] }
  0x16   :  { %253 = vmatprep.subr.mxu0 %v341_v0  ;;  %288 = vmatprep.subr.mxu1 %v341_v0  ;;  %v26_v29 = vld [vmem:[#allocation2] sm:$0xff]  ;;  %v118_v31 = vld [vmem:[%s501_s2 + $0x10] sm:$0xff]  ;;  %v117_v32 = vld [vmem:[%s501_s2 + $0x8] sm:$0xff] }
  0x17   :  { %254 = vmatpush3.msra.mxu0 %v38_v6  ;;  %289 = vmatpush3.msra.mxu1 %v127_v12  ;;  %v116_v33 = vld [vmem:[%s501_s2] sm:$0xff] }
  0x18   :  { %255 = vmatprep.subr.mxu0 %v341_v0  ;;  %290 = vmatprep.subr.mxu1 %v341_v0 }
  0x19   :  { %256 = vmatpush3.msra.mxu0 %v37_v9  ;;  %291 = vmatpush3.msra.mxu1 %v126_v14 }
  0x1a   :  { %257 = vmatprep.subr.mxu0 %v341_v0  ;;  %292 = vmatprep.subr.mxu1 %v341_v0 }
  0x1b   :  { %258 = vmatpush3.msra.mxu0 %v36_v11  ;;  %293 = vmatpush3.msra.mxu1 %v125_v16 }
  0x1c   :  { %259 = vmatprep.subr.mxu0 %v341_v0  ;;  %294 = vmatprep.subr.mxu1 %v341_v0 }
  0x1d   :  { %260 = vmatpush3.msra.mxu0 %v35_v13  ;;  %295 = vmatpush3.msra.mxu1 %v124_v18 }
  0x1e   :  { %261 = vmatprep.subr.mxu0 %v341_v0  ;;  %296 = vmatprep.subr.mxu1 %v341_v0 }
  0x1f   :  { %262 = vmatpush3.msra.mxu0 %v34_v15  ;;  %297 = vmatpush3.msra.mxu1 %v123_v20 }
  0x20   :  { %263 = vmatprep.subr.mxu0 %v341_v0  ;;  %298 = vmatprep.subr.mxu1 %v341_v0 }
  0x21   :  { %264 = vmatpush3.msra.mxu0 %v33_v17  ;;  %299 = vmatpush3.msra.mxu1 %v122_v22 }
  0x22   :  { %265 = vmatprep.subr.mxu0 %v341_v0  ;;  %300 = vmatprep.subr.mxu1 %v341_v0 }
  0x23   :  { %266 = vmatpush3.msra.mxu0 %v32_v19  ;;  %301 = vmatpush3.msra.mxu1 %v121_v24 }
  0x24   :  { %267 = vmatprep.subr.mxu0 %v341_v0  ;;  %302 = vmatprep.subr.mxu1 %v341_v0 }
  0x25   :  { %268 = vmatpush3.msra.mxu0 %v31_v21  ;;  %303 = vmatpush3.msra.mxu1 %v120_v26 }
  0x26   :  { %269 = vmatprep.subr.mxu0 %v341_v0  ;;  %304 = vmatprep.subr.mxu1 %v341_v0 }
  0x27   :  { %270 = vmatpush3.msra.mxu0 %v30_v23  ;;  %305 = vmatpush3.msra.mxu1 %v119_v30 }
  0x28   :  { %271 = vmatprep.subr.mxu0 %v341_v0  ;;  %306 = vmatprep.subr.mxu1 %v341_v0 }
  0x29   :  { %272 = vmatpush3.msra.mxu0 %v29_v25  ;;  %307 = vmatpush3.msra.mxu1 %v118_v31 }
  0x2a   :  { %273 = vmatprep.subr.mxu0 %v341_v0  ;;  %308 = vmatprep.subr.mxu1 %v341_v0 }
  0x2b   :  { %274 = vmatpush3.msra.mxu0 %v28_v27  ;;  %309 = vmatpush3.msra.mxu1 %v117_v32 }
  0x2c   :  { %275 = vmatprep.subr.mxu0 %v341_v0  ;;  %310 = vmatprep.subr.mxu1 %v341_v0 }
  0x2d   :  { %276 = vmatpush3.msra.mxu0 %v27_v28  ;;  %311 = vmatpush3.msra.mxu1 %v116_v33 }
  0x2e   :  { %278 = vmatmul.mubr.f32.vlgmr.msra.gmra.mxu0 %v26_v29 }
  0xee   :  { %v109_v34 = vpop.f32.mrf.mxu0 }
  0xef   :  { %v113_v35 = vmul.f32 2.0, %v109_v34 }
  0xf0   :  { %v279_v36 = vpop.f32.mrf.mxu0 }
  0xf1   :  { %v114_v37 = vmul.f32 %v113_v35, %v109_v34 }
  0xf3   :  { %v210_v38 = vadd.f32 -1.0, %v114_v37 }
  0xf5   :  { %313 = vmatmul.mubr.f32.vlgmr.msra.gmra.mxu1 %v210_v38 }
 0x1b5   :  { %v198_v39 = vpop.f32.mrf.mxu1 }
 0x1b6   :  { %v202_v40 = vsub.f32 0.0, %v198_v39 }
 0x1b7   :  { %v314_v41 = vpop.f32.mrf.mxu1 }
 0x1b8   :  { %204 = vst.msk [vmem:[%s502_s3] sm:$0xff] %vm203_vm1, %v202_v40 }
 0x1b9   :  { %209 = vsyncpa [#allocation3], 1 }

</bundles_post_ra>
